<compile_context>
chip_gen: v7x
topology: tpu7x:2x2x1
jax: 0.10.0
libtpu: 0.0.40
codegen_flags: <defaults>
</compile_context>

<pallas_src>
import functools

import jax
import jax.numpy as jnp
import numpy as np
from jax.experimental import pallas as pl
from jax.experimental.pallas import tpu as pltpu


def _round_up(x, m):
    return (x + m - 1) // m * m


# ---------------------------------------------------------------------------
# Tuning knobs (derived from VMEM capacity, with conservative fallbacks).
# ---------------------------------------------------------------------------
def _vmem_capacity_bytes():
    try:
        return int(pltpu.get_tpu_info().vmem_capacity_bytes)
    except Exception:
        return 64 * 1024 * 1024  # v7x per-core VMEM; smallest of v5e/v6e/v7x


_VMEM_CAP = _vmem_capacity_bytes()
# Raise the scoped-VMEM limit (defaults are only 16/32 MiB) but stay well under
# physical: 48 MiB on v7x (64 MiB physical), 64 MiB on v5e/v6e (128 MiB).
_VMEM_LIMIT = int(min((_VMEM_CAP * 3) // 4, 64 * 1024 * 1024))
# Streamed bytes per pass-1 grid step (amortizes the ~0.35us per-step cost):
# ~8 MiB on v5e/v6e, ~4 MiB on v7x (half the VMEM, higher HBM bandwidth).
_TARGET_STEP_BYTES = (8 * 1024 * 1024
                      if _VMEM_CAP >= 128 * 1024 * 1024 else 4 * 1024 * 1024)
_MAX_TILE_E = 65536
_PASS2_MAX_ROWS = 4096               # (4096, 128) f32 block = 2 MiB
# In-kernel vector gather only pays off while the f32 node table is small (the
# lane-gather cost grows with table width); larger graphs use the streamed path.
_RESIDENT_TABLE_MAX_BYTES = 256 * 1024

# Flipped to False the first time the in-kernel gather fails to lower; after
# that every call uses the streamed path (robust across Mosaic versions with
# different dynamic-gather support).
_RESIDENT_GATHER_OK = [True]


# ---------------------------------------------------------------------------
# Kernels
# ---------------------------------------------------------------------------
def _pass1_streamed_kernel(za_ref, zb_ref, inv_ref, tmax_ref, *, n_edges, tile_e):
    """inv = 1/||za - zb + eps|| over a (D, TILE_E) block; edges on lanes."""
    za = za_ref[...].astype(jnp.float32)
    zb = zb_ref[...].astype(jnp.float32)
    diff = za - zb + 1e-6                              # eps as in F.pairwise_distance
    inv = jax.lax.rsqrt(jnp.sum(diff * diff, axis=0, keepdims=True))
    lane = jax.lax.broadcasted_iota(jnp.int32, (1, tile_e), 1)
    edge_id = pl.program_id(0) * tile_e + lane
    inv = jnp.where(edge_id < n_edges, inv, -jnp.inf)  # mask padded lanes
    inv_ref[...] = inv
    tmax_ref[...] = jnp.broadcast_to(jnp.max(inv, axis=1, keepdims=True), (1, 128))


def _pass1_resident_kernel(tbl_ref, e0_ref, e1_ref, inv_ref, tmax_ref, *,
                           n_edges, tile_e, chunk):
    """Same math, but z[e0]/z[e1] are gathered IN-KERNEL from a VMEM-resident
    (D, N_pad) node table.  Works in lane chunks to keep the live vreg set
    small while still amortizing the per-grid-step cost with a big tile."""
    d = tbl_ref.shape[0]
    tbl = tbl_ref[...].astype(jnp.float32)             # hoisted out of the loop
    base = pl.program_id(0) * tile_e

    def body(c, run):
        off = pl.multiple_of(c * chunk, chunk)
        i0 = jnp.broadcast_to(e0_ref[:, pl.ds(off, chunk)], (d, chunk))
        i1 = jnp.broadcast_to(e1_ref[:, pl.ds(off, chunk)], (d, chunk))
        za = jnp.take_along_axis(tbl, i0, axis=1, mode="promise_in_bounds")
        zb = jnp.take_along_axis(tbl, i1, axis=1, mode="promise_in_bounds")
        diff = za - zb + 1e-6
        inv = jax.lax.rsqrt(jnp.sum(diff * diff, axis=0, keepdims=True))
        lane = jax.lax.broadcasted_iota(jnp.int32, (1, chunk), 1)
        inv = jnp.where(base + off + lane < n_edges, inv, -jnp.inf)
        inv_ref[:, pl.ds(off, chunk)] = inv
        return jnp.maximum(run, jnp.max(inv, axis=1, keepdims=True))

    run = jax.lax.fori_loop(0, tile_e // chunk, body,
                            jnp.full((1, 1), -jnp.inf, jnp.float32))
    tmax_ref[...] = jnp.broadcast_to(run, (1, 128))


def _exp_norm_kernel(gmax_ref, inv_ref, out_ref):
    """probs = exp(inv - max(inv))  ==  (sigmoid(p)*softmax(inv)) / max(...)."""
    out_ref[...] = jnp.exp(inv_ref[...] - gmax_ref[0, 0])


# ---------------------------------------------------------------------------
# pallas_call wrappers
# ---------------------------------------------------------------------------
def _compiler_params():
    return pltpu.CompilerParams(dimension_semantics=("parallel",),
                                vmem_limit_bytes=_VMEM_LIMIT)


def _pass1_streamed_call(zaT, zbT, *, n_edges, tile_e, e_pad, num_tiles):
    d = zaT.shape[0]
    return pl.pallas_call(
        functools.partial(_pass1_streamed_kernel, n_edges=n_edges, tile_e=tile_e),
        out_shape=(jax.ShapeDtypeStruct((1, e_pad), jnp.float32),
                   jax.ShapeDtypeStruct((1, num_tiles * 128), jnp.float32)),
        grid=(num_tiles,),
        in_specs=[pl.BlockSpec((d, tile_e), lambda i: (0, i)),
                  pl.BlockSpec((d, tile_e), lambda i: (0, i))],
        out_specs=(pl.BlockSpec((1, tile_e), lambda i: (0, i)),
                   pl.BlockSpec((1, 128), lambda i: (0, i))),
        compiler_params=_compiler_params(),
    )(zaT, zbT)


def _pass1_resident_call(tbl, e0p, e1p, *, n_edges, tile_e, e_pad, num_tiles, chunk):
    d, n_pad = tbl.shape
    return pl.pallas_call(
        functools.partial(_pass1_resident_kernel, n_edges=n_edges,
                          tile_e=tile_e, chunk=chunk),
        out_shape=(jax.ShapeDtypeStruct((1, e_pad), jnp.float32),
                   jax.ShapeDtypeStruct((1, num_tiles * 128), jnp.float32)),
        grid=(num_tiles,),
        in_specs=[pl.BlockSpec((d, n_pad), lambda i: (0, 0)),   # resident node table
                  pl.BlockSpec((1, tile_e), lambda i: (0, i)),
                  pl.BlockSpec((1, tile_e), lambda i: (0, i))],
        out_specs=(pl.BlockSpec((1, tile_e), lambda i: (0, i)),
                   pl.BlockSpec((1, 128), lambda i: (0, i))),
        compiler_params=_compiler_params(),
    )(tbl, e0p, e1p)


# ---------------------------------------------------------------------------
# Tiling helpers
# ---------------------------------------------------------------------------
def _choose_tiling(E, D, itemsize, tile_e=None):
    e128 = _round_up(E, 128)
    if tile_e is None:
        te = _TARGET_STEP_BYTES // (2 * D * itemsize)
        te = max(1024, min(_MAX_TILE_E, (te // 128) * 128))
    else:
        te = max(128, (int(tile_e) // 128) * 128)
    te = min(te, e128)
    # Prefer >= 2 grid steps so the "parallel" axis can split across TensorCores.
    if te == e128 and e128 >= 256:
        te = _round_up(e128 // 2, 128)
    e_pad = _round_up(E, te)
    return te, e_pad, e_pad // te


def _choose_pass2_rows(rows):
    """Largest row block <= _PASS2_MAX_ROWS that divides `rows` and is a
    multiple of 8 (BlockSpec sublane rule); else the whole array as one block."""
    if rows <= _PASS2_MAX_ROWS:
        return rows
    cap = _PASS2_MAX_ROWS - (_PASS2_MAX_ROWS % 8)
    for rb in range(cap, 0, -8):
        if rows % rb == 0:
            return rb
    return rows


# ---------------------------------------------------------------------------
# Forward
# ---------------------------------------------------------------------------
def softmax_decoder_forward(z, edge_index, p=None, *, tile_e=None,
                            use_resident_table=None):
    """JAX/Pallas equivalent of SoftmaxDecoder.forward(z, edge_index) -> (E,).

    `p` is accepted for API parity only: sigmoid(p) (and the softmax
    denominator) cancel exactly in scores / max(scores), so the forward output
    carries no dependence on p.  Callers that need the un-normalized scores or
    a gradient through p must handle that outside this kernel.
    """
    del p
    e0 = jnp.asarray(edge_index[0], jnp.int32)
    e1 = jnp.asarray(edge_index[1], jnp.int32)
    E = int(e0.shape[0])
    if E == 0:                              # guard: empty edge list -> empty probs
        return jnp.zeros((0,), jnp.float32)
    N, D = int(z.shape[0]), int(z.shape[1])
    itemsize = jnp.dtype(z.dtype).itemsize
    te, e_pad, num_tiles = _choose_tiling(E, D, itemsize, tile_e)
    pad = e_pad - E
    e0p = jnp.pad(e0, (0, pad))
    e1p = jnp.pad(e1, (0, pad))
    zT = z.T                                # (D, N) node table, native dtype

    n_pad = _round_up(N, 128)
    chunk = 512 if te % 512 == 0 else (256 if te % 256 == 0 else 128)
    try_resident = (use_resident_table is not False
                    and _RESIDENT_GATHER_OK[0]
                    and n_pad * D * 4 <= _RESIDENT_TABLE_MAX_BYTES)

    inv = tmax = None
    if try_resident:
        try:
            tbl = jnp.pad(zT, ((0, 0), (0, n_pad - N)))
            inv, tmax = _pass1_resident_call(
                tbl, e0p.reshape(1, e_pad), e1p.reshape(1, e_pad),
                n_edges=E, tile_e=te, e_pad=e_pad, num_tiles=num_tiles,
                chunk=chunk)
            jax.block_until_ready((inv, tmax))
        except Exception:  # e.g. Mosaic without dynamic-gather support
            _RESIDENT_GATHER_OK[0] = False
            inv = tmax = None

    if inv is None:
        # Streamed path: XLA gathers the edge embeddings (edges on lanes) and
        # pass 1 streams them with large blocks.
        # TODO(synk): for very large graphs an in-kernel DMA row gather
        # (scalar-prefetched edge ids + memory_space=pl.ANY node table) or
        # CompilerParams(allow_input_fusion=...) could remove this HBM
        # round-trip; the vector gather above only pays off for small tables.
        zaT = jnp.take(zT, e0p, axis=1)      # (D, E_pad)
        zbT = jnp.take(zT, e1p, axis=1)
        inv, tmax = _pass1_streamed_call(zaT, zbT, n_edges=E, tile_e=te,
                                         e_pad=e_pad, num_tiles=num_tiles)

    # Cross-tile (and cross-core) combine of the partial maxes: tiny XLA reduce.
    gmax = jnp.max(tmax).reshape(1, 1)

    # Pass 2: full-occupancy (rows, 128) layout, output aliased onto the input.
    rows = e_pad // 128
    inv2d = inv.reshape(rows, 128)
    rb = _choose_pass2_rows(rows)
    probs2d = pl.pallas_call(
        _exp_norm_kernel,
        out_shape=jax.ShapeDtypeStruct((rows, 128), jnp.float32),
        grid=(rows // rb,),
        in_specs=[pl.BlockSpec(memory_space=pltpu.MemorySpace.SMEM),  # global max
                  pl.BlockSpec((rb, 128), lambda i: (i, 0))],
        out_specs=pl.BlockSpec((rb, 128), lambda i: (i, 0)),
        input_output_aliases={1: 0},
        compiler_params=_compiler_params(),
    )(gmax, inv2d)

    return probs2d.reshape(e_pad)[:E]        # == probs.squeeze()


def _reference(z, edge_index, p):
    """Pure-JAX reference of the PyTorch forward (unsimplified formula)."""
    za = z[edge_index[0]].astype(jnp.float32)
    zb = z[edge_index[1]].astype(jnp.float32)
    dist = jnp.sqrt(jnp.sum((za - zb + 1e-6) ** 2, axis=-1))
    scores = jax.nn.sigmoid(jnp.asarray(p, jnp.float32)) * jax.nn.softmax(1.0 / dist)
    return scores / jnp.max(scores)


if __name__ == "__main__":
    key = jax.random.PRNGKey(0)
    kz, k0, k1, k2, k3 = jax.random.split(key, 5)

    # Small config consistent with the module: N nodes, D-dim embeddings, E edges.
    N, D, E = 16, 32, 8
    z = jax.random.normal(kz, (N, D), dtype=jnp.float32)
    e0 = jax.random.randint(k0, (E,), 0, N, dtype=jnp.int32)
    e1 = (e0 + jax.random.randint(k1, (E,), 1, N, dtype=jnp.int32)) % N   # no self-loops
    edge_index = jnp.stack([e0, e1])
    p_param = 0.5   # nn.Parameter p (cancels exactly in scores/max(scores))

    probs = softmax_decoder_forward(z, edge_index, p_param)
    jax.block_until_ready(probs)
    ref = _reference(z, edge_index, p_param)
    np.testing.assert_allclose(np.asarray(probs), np.asarray(ref), rtol=1e-4, atol=1e-6)

    # Multi-tile grid + lane-padding mask; exercise both pass-1 variants.
    E2 = 1500
    f0 = jax.random.randint(k2, (E2,), 0, N, dtype=jnp.int32)
    f1 = (f0 + jax.random.randint(k3, (E2,), 1, N, dtype=jnp.int32)) % N
    edge_index2 = jnp.stack([f0, f1])
    ref2 = _reference(z, edge_index2, p_param)

    probs2 = softmax_decoder_forward(z, edge_index2, p_param)   # resident (or fallback)
    jax.block_until_ready(probs2)
    np.testing.assert_allclose(np.asarray(probs2), np.asarray(ref2), rtol=1e-4, atol=1e-6)

    probs3 = softmax_decoder_forward(z, edge_index2, p_param,
                                     use_resident_table=False)  # streamed path
    jax.block_until_ready(probs3)
    np.testing.assert_allclose(np.asarray(probs3), np.asarray(ref2), rtol=1e-4, atol=1e-6)

    # TODO(synk): forward_all's Python loop scattering probs into an identity
    # adjacency matrix is not implemented (only forward() was requested).
    print("KERNEL_OK")
</pallas_src>

<mosaic_0001>
module attributes {stable_mosaic.version = 11 : i64} {
  func.func @_pass1_resident_kernel(%arg0: i32, %arg1: memref<32x128xf32, #tpu.memory_space<vmem>>, %arg2: memref<1x128xi32, #tpu.memory_space<vmem>>, %arg3: memref<1x128xi32, #tpu.memory_space<vmem>>, %arg4: memref<1x128xf32, #tpu.memory_space<vmem>>, %arg5: memref<1x128xf32, #tpu.memory_space<vmem>>) attributes {dimension_semantics = [#tpu.dimension_semantics<parallel>], iteration_bounds = array<i64: 1>, scalar_prefetch = 0 : i64, scratch_operands = 0 : i64, tpu.core_type = #tpu.core_type<tc>, window_params = [{pipeline_mode = #tpu.pipeline_mode<synchronous>, transform_indices = @transform_0, window_bounds = array<i64: 32, 128>}, {transform_indices = @transform_1, window_bounds = array<i64: 1, 128>}, {transform_indices = @transform_2, window_bounds = array<i64: 1, 128>}, {transform_indices = @transform_3, window_bounds = array<i64: 1, 128>}, {transform_indices = @transform_4, window_bounds = array<i64: 1, 128>}]} {
    %c0 = arith.constant 0 : index
    %c0_0 = arith.constant 0 : index
    %0 = vector.load %arg1[%c0, %c0_0] : memref<32x128xf32, #tpu.memory_space<vmem>>, vector<32x128xf32>
    %c128_i32 = arith.constant 128 : i32
    %1 = arith.muli %arg0, %c128_i32 : i32
    %cst = arith.constant 0xFF800000 : f32
    %2 = vector.broadcast %cst : f32 to vector<1x1xf32>
    %c0_i32 = arith.constant 0 : i32
    %c128_i32_1 = arith.constant 128 : i32
    %3 = arith.muli %c0_i32, %c128_i32_1 : i32
    %4 = tpu.assume_multiple %3, 128 : i32
    %c0_2 = arith.constant 0 : index
    %5 = arith.index_cast %4 : i32 to index
    %6 = vector.load %arg2[%c0_2, %5] : memref<1x128xi32, #tpu.memory_space<vmem>>, vector<1x128xi32>
    %7 = vector.shape_cast %6 : vector<1x128xi32> to vector<1x128xi32>
    %8 = vector.broadcast %7 : vector<1x128xi32> to vector<32x128xi32>
    %c0_3 = arith.constant 0 : index
    %9 = arith.index_cast %4 : i32 to index
    %10 = vector.load %arg3[%c0_3, %9] : memref<1x128xi32, #tpu.memory_space<vmem>>, vector<1x128xi32>
    %11 = vector.shape_cast %10 : vector<1x128xi32> to vector<1x128xi32>
    %12 = vector.broadcast %11 : vector<1x128xi32> to vector<32x128xi32>
    %13 = vector.shape_cast %8 : vector<32x128xi32> to vector<32x128x1xi32>
    %14 = vector.shape_cast %13 : vector<32x128x1xi32> to vector<32x128xi32>
    %15 = tpu.dynamic_gather %0[%14] in [1] : vector<32x128xf32>, vector<32x128xi32> -> vector<32x128xf32>
    %16 = vector.shape_cast %12 : vector<32x128xi32> to vector<32x128x1xi32>
    %17 = vector.shape_cast %16 : vector<32x128x1xi32> to vector<32x128xi32>
    %18 = tpu.dynamic_gather %0[%17] in [1] : vector<32x128xf32>, vector<32x128xi32> -> vector<32x128xf32>
    %19 = arith.subf %15, %18 : vector<32x128xf32>
    %cst_4 = arith.constant 9.99999997E-7 : f32
    %20 = vector.broadcast %cst_4 : f32 to vector<32x128xf32>
    %21 = arith.addf %19, %20 : vector<32x128xf32>
    %22 = arith.mulf %21, %21 : vector<32x128xf32>
    %cst_5 = arith.constant dense<0.000000e+00> : vector<128xf32>
    %23 = vector.multi_reduction <add>, %22, %cst_5 [0] : vector<32x128xf32> to vector<128xf32>
    %24 = vector.shape_cast %23 : vector<128xf32> to vector<1x128xf32>
    %25 = math.rsqrt %24 : vector<1x128xf32>
    %26 = tpu.iota {dimensions = array<i32: 1>} : vector<1x128xi32>
    %27 = arith.addi %1, %4 : i32
    %28 = vector.broadcast %27 : i32 to vector<1x128xi32>
    %29 = arith.addi %28, %26 : vector<1x128xi32>
    %c8_i32 = arith.constant 8 : i32
    %30 = vector.broadcast %c8_i32 : i32 to vector<1x128xi32>
    %31 = arith.cmpi slt, %29, %30 : vector<1x128xi32>
    %cst_6 = arith.constant 0xFF800000 : f32
    %32 = vector.broadcast %cst_6 : f32 to vector<1x128xf32>
    %33 = arith.select %31, %25, %32 : vector<1x128xi1>, vector<1x128xf32>
    %c0_7 = arith.constant 0 : index
    %34 = arith.index_cast %4 : i32 to index
    %35 = vector.load %arg4[%c0_7, %34] : memref<1x128xf32, #tpu.memory_space<vmem>>, vector<1x128xf32>
    tpu.vector_store %arg4[%c0_7, %34], %33 {strides = array<i32>} : memref<1x128xf32, #tpu.memory_space<vmem>>, vector<1x128xf32>,
    %cst_8 = arith.constant dense<0xFF800000> : vector<1xf32>
    %36 = vector.multi_reduction <maximumf>, %33, %cst_8 [1] : vector<1x128xf32> to vector<1xf32>
    %37 = vector.shape_cast %36 : vector<1xf32> to vector<1x1xf32>
    %38 = arith.maximumf %2, %37 : vector<1x1xf32>
    %c1_i32 = arith.constant 1 : i32
    %39 = vector.shape_cast %38 : vector<1x1xf32> to vector<1x1xf32>
    %40 = vector.broadcast %39 : vector<1x1xf32> to vector<1x128xf32>
    %c0_9 = arith.constant 0 : index
    %c0_10 = arith.constant 0 : index
    %41 = vector.load %arg5[%c0_9, %c0_10] : memref<1x128xf32, #tpu.memory_space<vmem>>, vector<1x128xf32>
    tpu.vector_store %arg5[%c0_9, %c0_10], %40 {strides = array<i32>} : memref<1x128xf32, #tpu.memory_space<vmem>>, vector<1x128xf32>,
    return
  }
  func.func @transform_0(%arg0: i32) -> (i32, i32) {
    %c0_i32 = arith.constant 0 : i32
    %c0_i32_0 = arith.constant 0 : i32
    %c0_i32_1 = arith.constant 0 : i32
    return %c0_i32, %c0_i32_0 : i32, i32
  }
  func.func @transform_1(%arg0: i32) -> (i32, i32) {
    %c0_i32 = arith.constant 0 : i32
    %c0_i32_0 = arith.constant 0 : i32
    return %c0_i32, %arg0 : i32, i32
  }
  func.func @transform_2(%arg0: i32) -> (i32, i32) {
    %c0_i32 = arith.constant 0 : i32
    %c0_i32_0 = arith.constant 0 : i32
    return %c0_i32, %arg0 : i32, i32
  }
  func.func @transform_3(%arg0: i32) -> (i32, i32) {
    %c0_i32 = arith.constant 0 : i32
    %c0_i32_0 = arith.constant 0 : i32
    return %c0_i32, %arg0 : i32, i32
  }
  func.func @transform_4(%arg0: i32) -> (i32, i32) {
    %c0_i32 = arith.constant 0 : i32
    %c0_i32_0 = arith.constant 0 : i32
    return %c0_i32, %arg0 : i32, i32
  }
}

module attributes {stable_mosaic.version = 11 : i64} {
  func.func @_pass1_streamed_kernel(%arg0: i32, %arg1: memref<32x128xf32, #tpu.memory_space<vmem>>, %arg2: memref<32x128xf32, #tpu.memory_space<vmem>>, %arg3: memref<1x128xf32, #tpu.memory_space<vmem>>, %arg4: memref<1x128xf32, #tpu.memory_space<vmem>>) attributes {dimension_semantics = [#tpu.dimension_semantics<parallel>], iteration_bounds = array<i64: 1>, scalar_prefetch = 0 : i64, scratch_operands = 0 : i64, tpu.core_type = #tpu.core_type<tc>, window_params = [{transform_indices = @transform_0, window_bounds = array<i64: 32, 128>}, {transform_indices = @transform_1, window_bounds = array<i64: 32, 128>}, {transform_indices = @transform_2, window_bounds = array<i64: 1, 128>}, {transform_indices = @transform_3, window_bounds = array<i64: 1, 128>}]} {
    %c0 = arith.constant 0 : index
    %c0_0 = arith.constant 0 : index
    %0 = vector.load %arg1[%c0, %c0_0] : memref<32x128xf32, #tpu.memory_space<vmem>>, vector<32x128xf32>
    %c0_1 = arith.constant 0 : index
    %c0_2 = arith.constant 0 : index
    %1 = vector.load %arg2[%c0_1, %c0_2] : memref<32x128xf32, #tpu.memory_space<vmem>>, vector<32x128xf32>
    %2 = arith.subf %0, %1 : vector<32x128xf32>
    %cst = arith.constant 9.99999997E-7 : f32
    %3 = vector.broadcast %cst : f32 to vector<32x128xf32>
    %4 = arith.addf %2, %3 : vector<32x128xf32>
    %5 = arith.mulf %4, %4 : vector<32x128xf32>
    %cst_3 = arith.constant dense<0.000000e+00> : vector<128xf32>
    %6 = vector.multi_reduction <add>, %5, %cst_3 [0] : vector<32x128xf32> to vector<128xf32>
    %7 = vector.shape_cast %6 : vector<128xf32> to vector<1x128xf32>
    %8 = math.rsqrt %7 : vector<1x128xf32>
    %9 = tpu.iota {dimensions = array<i32: 1>} : vector<1x128xi32>
    %c128_i32 = arith.constant 128 : i32
    %10 = arith.muli %arg0, %c128_i32 : i32
    %11 = vector.broadcast %10 : i32 to vector<1x128xi32>
    %12 = arith.addi %11, %9 : vector<1x128xi32>
    %c8_i32 = arith.constant 8 : i32
    %13 = vector.broadcast %c8_i32 : i32 to vector<1x128xi32>
    %14 = arith.cmpi slt, %12, %13 : vector<1x128xi32>
    %cst_4 = arith.constant 0xFF800000 : f32
    %15 = vector.broadcast %cst_4 : f32 to vector<1x128xf32>
    %16 = arith.select %14, %8, %15 : vector<1x128xi1>, vector<1x128xf32>
    %c0_5 = arith.constant 0 : index
    %c0_6 = arith.constant 0 : index
    %17 = vector.load %arg3[%c0_5, %c0_6] : memref<1x128xf32, #tpu.memory_space<vmem>>, vector<1x128xf32>
    tpu.vector_store %arg3[%c0_5, %c0_6], %16 {strides = array<i32>} : memref<1x128xf32, #tpu.memory_space<vmem>>, vector<1x128xf32>,
    %cst_7 = arith.constant dense<0xFF800000> : vector<1xf32>
    %18 = vector.multi_reduction <maximumf>, %16, %cst_7 [1] : vector<1x128xf32> to vector<1xf32>
    %19 = vector.shape_cast %18 : vector<1xf32> to vector<1x1xf32>
    %20 = vector.shape_cast %19 : vector<1x1xf32> to vector<1x1xf32>
    %21 = vector.broadcast %20 : vector<1x1xf32> to vector<1x128xf32>
    %c0_8 = arith.constant 0 : index
    %c0_9 = arith.constant 0 : index
    %22 = vector.load %arg4[%c0_8, %c0_9] : memref<1x128xf32, #tpu.memory_space<vmem>>, vector<1x128xf32>
    tpu.vector_store %arg4[%c0_8, %c0_9], %21 {strides = array<i32>} : memref<1x128xf32, #tpu.memory_space<vmem>>, vector<1x128xf32>,
    return
  }
  func.func @transform_0(%arg0: i32) -> (i32, i32) {
    %c0_i32 = arith.constant 0 : i32
    %c0_i32_0 = arith.constant 0 : i32
    return %c0_i32, %arg0 : i32, i32
  }
  func.func @transform_1(%arg0: i32) -> (i32, i32) {
    %c0_i32 = arith.constant 0 : i32
    %c0_i32_0 = arith.constant 0 : i32
    return %c0_i32, %arg0 : i32, i32
  }
  func.func @transform_2(%arg0: i32) -> (i32, i32) {
    %c0_i32 = arith.constant 0 : i32
    %c0_i32_0 = arith.constant 0 : i32
    return %c0_i32, %arg0 : i32, i32
  }
  func.func @transform_3(%arg0: i32) -> (i32, i32) {
    %c0_i32 = arith.constant 0 : i32
    %c0_i32_0 = arith.constant 0 : i32
    return %c0_i32, %arg0 : i32, i32
  }
}

</mosaic_0001>

<bundles_post_ra>
// kernel: tpu_custom_call.1
= control target key start
LH: loop header
LB: loop body
LE: loop exit
PB: predicated region body
PF: predicated region fallthrough
CT: control target
= control target key end

     0   :  { %10 = vsyncpa [#allocation3], 0  ;;  %s289_s0 = inlined_call_operand.hbm [shape: f32[32,128], index: 0, kind: input, shape index: {}]   ;;  %s290_s1 = inlined_call_operand.vmem [shape: s32[1,128], index: 1, kind: input, shape index: {}]   ;;  %s291_s2 = inlined_call_operand.vmem [shape: s32[1,128], index: 2, kind: input, shape index: {}]   ;;  %s292_s3 = inlined_call_operand.hbm [shape: f32[1,128], index: 3, kind: output, shape index: {0}]   ;;  %s293_s4 = inlined_call_operand.hbm [shape: f32[1,128], index: 4, kind: output, shape index: {1}]  }
   0x1   :  { %11 = vsyncpa [#allocation4], 0 }
   0x2   :  { %12 = vsyncpa [#allocation7], 0  ;;  %s217_s15 = smov [#allocation2]   ;;  %s145_s19 = scalar_lea.hbm %s289_s0, 512 }
   0x3   :  { %s18_s16 = sshll.u32 %s217_s15, 4  ;;  %p146_p0 = scmp.ne.s32.totalorder %s289_s0, %s145_s19  ;;  %s19_s16 = int_to_ptr.vmem [resolvable:$true] %s18_s16 }
   0x4   :  { %p149_p1 = scmp.lt.u32.totalorder %s145_s19, %s289_s0 }
   0x6   :  { %p151_p2 = pnand %p149_p1, %p146_p0 }
   0x8   :  { %154 = shalt.err (!%p151_p2)
}
   0x9   :  { %s155_s24 = scalar_lea.vmem %s19_s16, 512  ;;  %p160_p4 = scmp.lt.s32.totalorder %s19_s16, %s19_s16 }
   0xa   :  { %p156_p3 = scmp.ne.s32.totalorder %s19_s16, %s155_s24  ;;  %p161_p5 = scmp.lt.s32.totalorder %s155_s24, %s155_s24 }
   0xc   :  { %p162_p6 = por %p161_p5, %p160_p4 }
   0xe   :  { %p163_p7 = pnand %p162_p6, %p156_p3 }
  0x10   :  { %166 = shalt.err (!%p163_p7)
}
  0x11   :  { %s218_s25 = smov 128   ;;  %s219_s26 = smov 8  }
  0x12   :  { %24 = dma.hbm_to_vmem [thread:$0]  %s289_s0, 512, %s19_s16, [#allocation3], %s218_s25, %s218_s25, %s219_s26  }
  0x13   :  { %211 = dma.done.wait [#allocation3], 512  }
  0x14   :  { %212 = vsyncadd [#allocation3], 4294966784  ;;  %v134_v0 = vld [vmem:[%s291_s2] ss:$0 sm:$0xff]  ;;  %v33_v3 = vld [vmem:[#allocation2 + $0x8] sm:$0xff]  ;;  %v93_v35 = vlaneseq  ;;  %s220_s0 = smov [#allocation5]  }
  0x15   :  { %v133_v1 = vld [vmem:[%s290_s1] ss:$0 sm:$0xff]  ;;  %141 = vset.pattern.permute.xlu1 %v134_v0  ;;  %v34_v4 = vld [vmem:[#allocation2 + $0x10] sm:$0xff]  ;;  %v35_v5 = vld [vmem:[#allocation2 + $0x18] sm:$0xff]  ;;  %s110_s1 = sshll.u32 %s220_s0, 4  ;;  %s111_s1 = int_to_ptr.vmem [resolvable:$true] %s110_s1 }
  0x16   :  { %140 = vset.pattern.permute.xlu0 %v133_v1  ;;  %v32_v2 = vld [vmem:[#allocation2] sm:$0xff]  ;;  %v94_v36 = vand.u32 127, %v93_v35  ;;  %s167_s2 = scalar_lea.vmem %s111_s1, 16  ;;  %s171_s7 = scalar_lea.vmem %s111_s1, 32 }
  0x17   :  { %p168_p8 = scmp.ne.s32.totalorder %s111_s1, %s167_s2  ;;  %p172_p9 = scmp.lt.s32.totalorder %s111_s1, %s111_s1 }
  0x18   :  { %vm98_vm0 = vcmp.lt.s32.totalorder %v94_v36, 8  ;;  %p173_p10 = scmp.lt.s32.totalorder %s171_s7, %s167_s2 }
  0x19   :  { %60 = vperm.xlu1 %141, %v32_v2  }
  0x1a   :  { %48 = vperm.xlu0 %140, %v32_v2   ;;  %p174_p11 = por %p173_p10, %p172_p9 }
  0x1c   :  { %p175_p12 = pnand %p174_p11, %p168_p8 }
  0x1d   :  { %63 = vperm.xlu1 %141, %v33_v3  }
  0x1e   :  { %51 = vperm.xlu0 %140, %v33_v3  }
  0x21   :  { %66 = vperm.xlu1 %141, %v34_v4  }
  0x22   :  { %54 = vperm.xlu0 %140, %v34_v4  }
  0x25   :  { %69 = vperm.xlu1 %141, %v35_v5  }
  0x26   :  { %57 = vperm.xlu0 %140, %v35_v5  }
  0x2a   :  { %142 = vset.pattern.permute.xlu0 %v134_v0 }
  0x98   :  { %v61_v6 = vpop.permute.xlu1 %60 }
  0x99   :  { %v49_v7 = vpop.permute.xlu0 %48 }
  0x9a   :  { %v71_v10 = vsub.f32 %v49_v7, %v61_v6 }
  0x9c   :  { %v64_v8 = vpop.permute.xlu1 %63  ;;  %v75_v15 = vadd.f32 1e-06, %v71_v10 }
  0x9d   :  { %v52_v9 = vpop.permute.xlu0 %51 }
  0x9e   :  { %v72_v11 = vsub.f32 %v52_v9, %v64_v8  ;;  %v79_v21 = vmul.f32 %v75_v15, %v75_v15 }
  0xa0   :  { %v76_v12 = vadd.f32 1e-06, %v72_v11  ;;  %v67_v13 = vpop.permute.xlu1 %66 }
  0xa1   :  { %v55_v14 = vpop.permute.xlu0 %54 }
  0xa2   :  { %v73_v16 = vsub.f32 %v55_v14, %v67_v13  ;;  %v80_v17 = vmul.f32 %v76_v12, %v76_v12 }
  0xa4   :  { %v77_v18 = vadd.f32 1e-06, %v73_v16  ;;  %v70_v19 = vpop.permute.xlu1 %69  ;;  %v83_v24 = vadd.f32 %v80_v17, %v79_v21 }
  0xa5   :  { %v58_v20 = vpop.permute.xlu0 %57 }
  0xa6   :  { %v81_v22 = vmul.f32 %v77_v18, %v77_v18  ;;  %v74_v23 = vsub.f32 %v58_v20, %v70_v19 }
  0xa8   :  { %v78_v25 = vadd.f32 1e-06, %v74_v23  ;;  %v84_v26 = vadd.f32 %v83_v24, %v81_v22 }
  0xaa   :  { %v82_v27 = vmul.f32 %v78_v25, %v78_v25 }
  0xac   :  { %v85_v28 = vadd.f32 %v84_v26, %v82_v27 }
  0xae   :  { %v86_v29 = vrot.slane %v85_v28, 4 }
  0xb0   :  { %v87_v30 = vadd.f32 %v86_v29, %v85_v28 }
  0xb2   :  { %v88_v31 = vrot.slane %v87_v30, 2 }
  0xb4   :  { %v89_v32 = vadd.f32 %v88_v31, %v87_v30 }
  0xb6   :  { %v90_v33 = vrot.slane %v89_v32, 1 }
  0xb8   :  { %v91_v34 = vadd.f32 %v90_v33, %v89_v32 }
  0xba   :  { %143 = vrsqrt.f32 %v91_v34 }
  0xc4   :  { %v144_v37 = vpop.eup %143 }
  0xc5   :  { %v99_v38 = vsel %vm98_vm0, %v144_v37, -inf }
  0xc6   :  { %101 = vmax.xlane.f32.xlu0 %v99_v38  ;;  %100 = vst [vmem:[#allocation5] sm:$0x1] %v99_v38 }
  0xc7   :  { %178 = shalt.err (!%p175_p12)
}
  0xc8   :  { %s179_s10 = scalar_lea.hbm %s292_s3, 16 }
  0xc9   :  { %p180_p13 = scmp.ne.s32.totalorder %s292_s3, %s179_s10  ;;  %p183_p0 = scmp.lt.u32.totalorder %s179_s10, %s292_s3 }
  0xcb   :  { %p185_p1 = pnand %p183_p0, %p180_p13 }
  0xcd   :  { %188 = shalt.err (!%p185_p1)
}
  0xce   :  { %113 = dma.vmem_to_hbm [thread:$0]  %s111_s1, 16, %s292_s3, [#allocation4]  }
  0xcf   :  { %s221_s17 = smov [#allocation6]  }
  0xd0   :  { %s120_s18 = sshll.u32 %s221_s17, 4  ;;  %s121_s18 = int_to_ptr.vmem [resolvable:$true] %s120_s18 }
  0xd1   :  { %s189_s19 = scalar_lea.vmem %s121_s18, 16  ;;  %s193_s20 = scalar_lea.vmem %s121_s18, 32 }
  0xd2   :  { %p190_p2 = scmp.ne.s32.totalorder %s121_s18, %s189_s19  ;;  %p194_p3 = scmp.lt.s32.totalorder %s121_s18, %s121_s18 }
  0xd3   :  { %p195_p4 = scmp.lt.s32.totalorder %s193_s20, %s189_s19 }
  0xd5   :  { %p196_p5 = por %p195_p4, %p194_p3 }
  0xd7   :  { %p197_p6 = pnand %p196_p5, %p190_p2 }
 0x153   :  { %v102_v39 = vpop.xlane.xlu0 %101 }
 0x154   :  { %103 = vst [vmem:[#allocation6] sm:$0x1] %v102_v39 }
 0x155   :  { %200 = shalt.err (!%p197_p6)
}
 0x156   :  { %s201_s23 = scalar_lea.hbm %s293_s4, 16 }
 0x157   :  { %p202_p7 = scmp.ne.s32.totalorder %s293_s4, %s201_s23  ;;  %p205_p8 = scmp.lt.u32.totalorder %s201_s23, %s293_s4 }
 0x159   :  { %p207_p9 = pnand %p205_p8, %p202_p7 }
 0x15b   :  { %210 = shalt.err (!%p207_p9)
}
 0x15c   :  { %123 = dma.vmem_to_hbm [thread:$0]  %s121_s18, 16, %s293_s4, [#allocation7]  }
 0x15d   :  { %213 = dma.done.wait [#allocation4], 16  }
 0x15e   :  { %214 = vsyncadd [#allocation4], 4294967280 }
 0x15f   :  { %215 = dma.done.wait [#allocation7], 16  }
 0x160   :  { %216 = vsyncadd [#allocation7], 4294967280 }
 0x161   :  { %130 = vsyncpa [#allocation3], 1 }
 0x162   :  { %131 = vsyncpa [#allocation4], 1 }
 0x163   :  { %132 = vsyncpa [#allocation7], 1 }

// kernel: tpu_custom_call.1
= control target key start
LH: loop header
LB: loop body
LE: loop exit
PB: predicated region body
PF: predicated region fallthrough
CT: control target
= control target key end

     0   :  { %9 = vsyncpa [#allocation3], 0  ;;  %s292_s0 = inlined_call_operand.hbm [shape: f32[32,128], index: 0, kind: input, shape index: {}]   ;;  %s293_s1 = inlined_call_operand.hbm [shape: f32[32,128], index: 1, kind: input, shape index: {}]   ;;  %s294_s2 = inlined_call_operand.hbm [shape: f32[1,128], index: 2, kind: output, shape index: {0}]   ;;  %s295_s3 = inlined_call_operand.hbm [shape: f32[1,128], index: 3, kind: output, shape index: {1}]  }
   0x1   :  { %10 = vsyncpa [#allocation6], 0 }
   0x2   :  { %11 = vsyncpa [#allocation4], 0 }
   0x3   :  { %12 = vsyncpa [#allocation9], 0  ;;  %s218_s12 = smov [#allocation2]   ;;  %s122_s16 = scalar_lea.hbm %s292_s0, 512 }
   0x4   :  { %s18_s13 = sshll.u32 %s218_s12, 4  ;;  %p123_p0 = scmp.ne.s32.totalorder %s292_s0, %s122_s16  ;;  %s19_s13 = int_to_ptr.vmem [resolvable:$true] %s18_s13 }
   0x5   :  { %p126_p1 = scmp.lt.u32.totalorder %s122_s16, %s292_s0 }
   0x7   :  { %p128_p2 = pnand %p126_p1, %p123_p0 }
   0x9   :  { %131 = shalt.err (!%p128_p2)
}
   0xa   :  { %s132_s21 = scalar_lea.vmem %s19_s13, 512  ;;  %p137_p4 = scmp.lt.s32.totalorder %s19_s13, %s19_s13 }
   0xb   :  { %p133_p3 = scmp.ne.s32.totalorder %s19_s13, %s132_s21  ;;  %p138_p5 = scmp.lt.s32.totalorder %s132_s21, %s132_s21 }
   0xd   :  { %p139_p6 = por %p138_p5, %p137_p4 }
   0xf   :  { %p140_p7 = pnand %p139_p6, %p133_p3 }
  0x11   :  { %143 = shalt.err (!%p140_p7)
}
  0x12   :  { %s219_s22 = smov 128   ;;  %s220_s23 = smov 8  }
  0x13   :  { %24 = dma.hbm_to_vmem [thread:$0]  %s292_s0, 512, %s19_s13, [#allocation3], %s219_s22, %s219_s22, %s220_s23  }
  0x14   :  { %s221_s26 = smov [#allocation5]   ;;  %s144_s30 = scalar_lea.hbm %s293_s1, 512 }
  0x15   :  { %s30_s27 = sshll.u32 %s221_s26, 4  ;;  %p145_p8 = scmp.ne.s32.totalorder %s293_s1, %s144_s30  ;;  %s31_s27 = int_to_ptr.vmem [resolvable:$true] %s30_s27 }
  0x16   :  { %p148_p9 = scmp.lt.u32.totalorder %s144_s30, %s293_s1 }
  0x18   :  { %p150_p10 = pnand %p148_p9, %p145_p8 }
  0x1a   :  { %153 = shalt.err (!%p150_p10)
}
  0x1b   :  { %s154_s8 = scalar_lea.vmem %s31_s27, 512  ;;  %p159_p12 = scmp.lt.s32.totalorder %s31_s27, %s31_s27 }
  0x1c   :  { %p155_p11 = scmp.ne.s32.totalorder %s31_s27, %s154_s8  ;;  %p160_p13 = scmp.lt.s32.totalorder %s154_s8, %s154_s8 }
  0x1e   :  { %p161_p0 = por %p160_p13, %p159_p12 }
  0x20   :  { %p162_p1 = pnand %p161_p0, %p155_p11 }
  0x22   :  { %165 = shalt.err (!%p162_p1)
}
  0x23   :  { %36 = dma.hbm_to_vmem [thread:$0]  %s293_s1, 512, %s31_s27, [#allocation6], %s219_s22, %s219_s22, %s220_s23  }
  0x24   :  { %210 = dma.done.wait [#allocation3], 512  }
  0x25   :  { %211 = vsyncadd [#allocation3], 4294966784 }
  0x26   :  { %212 = dma.done.wait [#allocation6], 512  }
  0x27   :  { %213 = vsyncadd [#allocation6], 4294966784  ;;  %v43_v0 = vld [vmem:[#allocation2] sm:$0xff]  ;;  %v44_v1 = vld [vmem:[#allocation2 + $0x8] sm:$0xff]  ;;  %v73_v29 = vlaneseq  ;;  %s222_s1 = smov [#allocation7]  }
  0x28   :  { %v45_v2 = vld [vmem:[#allocation2 + $0x10] sm:$0xff]  ;;  %v46_v3 = vld [vmem:[#allocation2 + $0x18] sm:$0xff]  ;;  %v47_v4 = vld [vmem:[#allocation5] sm:$0xff]  ;;  %s90_s10 = sshll.u32 %s222_s1, 4  ;;  %s91_s10 = int_to_ptr.vmem [resolvable:$true] %s90_s10 }
  0x29   :  { %v48_v5 = vld [vmem:[#allocation5 + $0x8] sm:$0xff]  ;;  %v49_v6 = vld [vmem:[#allocation5 + $0x10] sm:$0xff]  ;;  %v50_v7 = vld [vmem:[#allocation5 + $0x18] sm:$0xff]  ;;  %v51_v8 = vsub.f32 %v43_v0, %v47_v4  ;;  %v74_v30 = vand.u32 127, %v73_v29  ;;  %s166_s11 = scalar_lea.vmem %s91_s10, 16  ;;  %s170_s12 = scalar_lea.vmem %s91_s10, 32 }
  0x2a   :  { %v52_v9 = vsub.f32 %v44_v1, %v48_v5  ;;  %v53_v10 = vsub.f32 %v45_v2, %v49_v6  ;;  %v54_v11 = vsub.f32 %v46_v3, %v50_v7  ;;  %p167_p2 = scmp.ne.s32.totalorder %s91_s10, %s166_s11  ;;  %p171_p3 = scmp.lt.s32.totalorder %s91_s10, %s91_s10 }
  0x2b   :  { %v55_v12 = vadd.f32 1e-06, %v51_v8  ;;  %vm78_vm0 = vcmp.lt.s32.totalorder %v74_v30, 8  ;;  %p172_p4 = scmp.lt.s32.totalorder %s170_s12, %s166_s11 }
  0x2c   :  { %v56_v13 = vadd.f32 1e-06, %v52_v9  ;;  %v57_v14 = vadd.f32 1e-06, %v53_v10  ;;  %v58_v15 = vadd.f32 1e-06, %v54_v11 }
  0x2d   :  { %v59_v16 = vmul.f32 %v55_v12, %v55_v12  ;;  %p173_p5 = por %p172_p4, %p171_p3 }
  0x2e   :  { %v60_v17 = vmul.f32 %v56_v13, %v56_v13  ;;  %v61_v18 = vmul.f32 %v57_v14, %v57_v14  ;;  %v62_v19 = vmul.f32 %v58_v15, %v58_v15 }
  0x2f   :  { %p174_p6 = pnand %p173_p5, %p167_p2 }
  0x30   :  { %v63_v20 = vadd.f32 %v60_v17, %v59_v16 }
  0x32   :  { %v64_v21 = vadd.f32 %v63_v20, %v61_v18 }
  0x34   :  { %v65_v22 = vadd.f32 %v64_v21, %v62_v19 }
  0x36   :  { %v66_v23 = vrot.slane %v65_v22, 4 }
  0x38   :  { %v67_v24 = vadd.f32 %v66_v23, %v65_v22 }
  0x3a   :  { %v68_v25 = vrot.slane %v67_v24, 2 }
  0x3c   :  { %v69_v26 = vadd.f32 %v68_v25, %v67_v24 }
  0x3e   :  { %v70_v27 = vrot.slane %v69_v26, 1 }
  0x40   :  { %v71_v28 = vadd.f32 %v70_v27, %v69_v26 }
  0x42   :  { %120 = vrsqrt.f32 %v71_v28 }
  0x4c   :  { %v121_v31 = vpop.eup %120 }
  0x4d   :  { %v79_v32 = vsel %vm78_vm0, %v121_v31, -inf }
  0x4e   :  { %80 = vst [vmem:[#allocation7] sm:$0x1] %v79_v32  ;;  %81 = vmax.xlane.f32.xlu0 %v79_v32 }
  0x4f   :  { %177 = shalt.err (!%p174_p6)
}
  0x50   :  { %s178_s15 = scalar_lea.hbm %s294_s2, 16 }
  0x51   :  { %p179_p7 = scmp.ne.s32.totalorder %s294_s2, %s178_s15  ;;  %p182_p8 = scmp.lt.u32.totalorder %s178_s15, %s294_s2 }
  0x53   :  { %p184_p9 = pnand %p182_p8, %p179_p7 }
  0x55   :  { %187 = shalt.err (!%p184_p9)
}
  0x56   :  { %93 = dma.vmem_to_hbm [thread:$0]  %s91_s10, 16, %s294_s2, [#allocation4]  }
  0x57   :  { %s223_s22 = smov [#allocation8]  }
  0x58   :  { %s100_s23 = sshll.u32 %s223_s22, 4  ;;  %s101_s23 = int_to_ptr.vmem [resolvable:$true] %s100_s23 }
  0x59   :  { %s188_s24 = scalar_lea.vmem %s101_s23, 16  ;;  %s192_s25 = scalar_lea.vmem %s101_s23, 32 }
  0x5a   :  { %p189_p10 = scmp.ne.s32.totalorder %s101_s23, %s188_s24  ;;  %p193_p11 = scmp.lt.s32.totalorder %s101_s23, %s101_s23 }
  0x5b   :  { %p194_p12 = scmp.lt.s32.totalorder %s192_s25, %s188_s24 }
  0x5d   :  { %p195_p13 = por %p194_p12, %p193_p11 }
  0x5f   :  { %p196_p0 = pnand %p195_p13, %p189_p10 }
  0xdb   :  { %v82_v33 = vpop.xlane.xlu0 %81 }
  0xdc   :  { %83 = vst [vmem:[#allocation8] sm:$0x1] %v82_v33 }
  0xdd   :  { %199 = shalt.err (!%p196_p0)
}
  0xde   :  { %s200_s28 = scalar_lea.hbm %s295_s3, 16 }
  0xdf   :  { %p201_p1 = scmp.ne.s32.totalorder %s295_s3, %s200_s28  ;;  %p204_p2 = scmp.lt.u32.totalorder %s200_s28, %s295_s3 }
  0xe1   :  { %p206_p3 = pnand %p204_p2, %p201_p1 }
  0xe3   :  { %209 = shalt.err (!%p206_p3)
}
  0xe4   :  { %103 = dma.vmem_to_hbm [thread:$0]  %s101_s23, 16, %s295_s3, [#allocation9]  }
  0xe5   :  { %214 = dma.done.wait [#allocation4], 16  }
  0xe6   :  { %215 = vsyncadd [#allocation4], 4294967280 }
  0xe7   :  { %216 = dma.done.wait [#allocation9], 16  }
  0xe8   :  { %217 = vsyncadd [#allocation9], 4294967280 }
  0xe9   :  { %110 = vsyncpa [#allocation3], 1 }
  0xea   :  { %111 = vsyncpa [#allocation6], 1 }
  0xeb   :  { %112 = vsyncpa [#allocation4], 1 }
  0xec   :  { %113 = vsyncpa [#allocation9], 1 }

</bundles_post_ra>
